<compile_context>
chip_gen: v7x
topology: tpu7x:2x2x1
jax: 0.10.0
libtpu: 0.0.40
codegen_flags: <defaults>
</compile_context>

<pallas_src>
import functools

import jax
import jax.numpy as jnp
from jax.experimental import pallas as pl
from jax.experimental.pallas import tpu as pltpu

IGNORE_INDEX = 0      # wrapper default
PAD_VALUE = 0         # wrapper default (unused in forward)

VOCAB = 128           # V (lane-dense vocab axis)
DIM = 32              # D (free parameter of the synthetic net)
MAX_SEQ_LEN = 64      # net.max_seq_len (only used by generate(), not forward)
LANES = 128           # partials row width (unmasked vst)
MAX_TILE_M = 1024     # rows per grid step on v6e/v7x (amortizes ~0.35us/step)
MAX_TILE_M_V5 = 256   # smaller tiles on v5-class chips (vreg/vst pressure)
SPLIT_M = 512         # above this, force >= 2 tiles (v7x: 2 TensorCores)


def _round_up(x, m):
    return ((x + m - 1) // m) * m


@functools.lru_cache(maxsize=None)
def _device_kind():
    try:
        return jax.devices()[0].device_kind.lower()
    except Exception:  # pragma: no cover - defensive
        return ""


def _select_tile_m(m, max_tile_m):
    if m <= min(SPLIT_M, max_tile_m):
        return _round_up(m, 8)
    # >= 2 tiles so the "parallel" grid axis spans both v7x TensorCores,
    # capped so each tile's f32 intermediates stay modest.
    return min(max_tile_m, _round_up(pl.cdiv(m, 2), 8))


def _net_ce_kernel(it_ref, ew1_ref, b1_ref, w2_ref, b2_ref, out_ref, *, accumulate):
    """One TILE_M-row tile: (folded) embed+MLP -> logits -> masked CE partials."""
    it = it_ref[...]                                     # (TILE_M, 2) int32
    ids = it[:, 0:1]                                     # (TILE_M, 1) token ids
    tgt = it[:, 1:2]                                     # (TILE_M, 1) targets
    tile_m = it.shape[0]

    col = jax.lax.broadcasted_iota(jnp.int32, (tile_m, VOCAB), 1)

    # Embedding gather folded into the first layer: one_hot(ids) @ (E @ W1).
    h = jnp.dot((col == ids).astype(jnp.bfloat16), ew1_ref[...],
                preferred_element_type=jnp.float32)      # (TILE_M, D) f32
    h = jnp.maximum(h + b1_ref[...], 0.0).astype(jnp.bfloat16)

    # logits = relu(...) @ W2 + b2                        (TILE_M, V) f32
    logits = jnp.dot(h, w2_ref[...], preferred_element_type=jnp.float32)
    logits = logits + b2_ref[...]

    # Softmax cross entropy.  Only the row max stays on the XLU; the exp-sum
    # and target-logit row reductions ride the idle MXU as (TILE_M,V)@(V,1)
    # bf16 matmuls (exact bf16-term products, f32 accumulation).
    row_max = jnp.max(logits, axis=-1, keepdims=True)    # (TILE_M, 1)
    ones_v = jnp.ones((VOCAB, 1), jnp.bfloat16)
    p16 = jnp.exp(logits - row_max).astype(jnp.bfloat16)
    denom = jnp.dot(p16, ones_v, preferred_element_type=jnp.float32)
    tgt16 = jnp.where(col == tgt, logits, 0.0).astype(jnp.bfloat16)
    tgt_logit = jnp.dot(tgt16, ones_v, preferred_element_type=jnp.float32)

    lse = row_max + jnp.log(denom)                       # (TILE_M, 1)
    valid = (tgt != IGNORE_INDEX).astype(jnp.float32)    # ignore_index + pad mask
    loss_sum = jnp.sum((lse - tgt_logit) * valid)
    count = jnp.sum(valid)

    # lane-dense partials row: [loss_sum, count, 0, ...] -> unmasked store
    lane = jax.lax.broadcasted_iota(jnp.int32, out_ref.shape, 2)
    row = jnp.where(lane == 0, loss_sum, jnp.where(lane == 1, count, 0.0))

    if accumulate:
        # Single resident accumulator block (single-TensorCore chips).
        @pl.when(pl.program_id(0) == 0)
        def _():
            out_ref[...] = jnp.zeros_like(out_ref)
        out_ref[...] += row
    else:
        out_ref[...] = row


def _fused_net_ce(ids, targets, emb_w1, b1, w2, b2):
    """Returns (loss_sum, valid_count) over all tokens, computed tile-by-tile."""
    M = ids.shape[0]

    kind = _device_kind()
    is_v5 = "v5" in kind
    single_tc = is_v5 or ("v6" in kind)          # v7x / unknown -> partials path
    max_tile_m = MAX_TILE_M_V5 if is_v5 else MAX_TILE_M

    tile_m = _select_tile_m(M, max_tile_m)
    m_pad = _round_up(M, tile_m)
    num_tiles = m_pad // tile_m
    pad = m_pad - M

    # Padded rows get target == IGNORE_INDEX -> excluded from loss and count.
    ids_p = jnp.pad(ids.astype(jnp.int32), (0, pad))
    tgt_p = jnp.pad(targets.astype(jnp.int32), (0, pad),
                    constant_values=IGNORE_INDEX)
    it = jnp.stack([ids_p, tgt_p], axis=-1)      # (m_pad, 2) single streamed input

    out_tiles = 1 if single_tc else num_tiles
    out_index_map = (lambda i: (0, 0, 0)) if single_tc else (lambda i: (i, 0, 0))
    semantics = ("arbitrary",) if single_tc else ("parallel",)

    weight_bytes = (VOCAB * DIM + DIM * VOCAB) * 2 + (DIM + VOCAB) * 4
    cost = pl.CostEstimate(
        flops=2 * m_pad * (VOCAB * DIM + DIM * VOCAB + 2 * VOCAB),
        transcendentals=m_pad * (VOCAB + 1),
        bytes_accessed=m_pad * 2 * 4 + weight_bytes + out_tiles * LANES * 4,
    )

    partials = pl.pallas_call(
        functools.partial(_net_ce_kernel, accumulate=single_tc),
        out_shape=jax.ShapeDtypeStruct((out_tiles, 1, LANES), jnp.float32),
        grid_spec=pltpu.PrefetchScalarGridSpec(
            num_scalar_prefetch=0,
            grid=(num_tiles,),
            in_specs=[
                pl.BlockSpec((tile_m, 2), lambda i: (i, 0)),       # [ids|targets]
                pl.BlockSpec((VOCAB, DIM), lambda i: (0, 0)),      # E@W1 (resident)
                pl.BlockSpec((1, DIM), lambda i: (0, 0)),          # b1 (resident)
                pl.BlockSpec((DIM, VOCAB), lambda i: (0, 0)),      # W2 (resident)
                pl.BlockSpec((1, VOCAB), lambda i: (0, 0)),        # b2 (resident)
            ],
            out_specs=pl.BlockSpec((1, 1, LANES), out_index_map),
        ),
        compiler_params=pltpu.CompilerParams(
            dimension_semantics=semantics,
            vmem_limit_bytes=32 * 1024 * 1024,
        ),
        cost_estimate=cost,
    )(it, emb_w1, b1, w2, b2)

    if single_tc:
        loss_sum = partials[0, 0, 0]
        count = partials[0, 0, 1]
    else:
        loss_sum = jnp.sum(partials[:, 0, 0])
        count = jnp.sum(partials[:, 0, 1])
    return loss_sum, count


class AutoregressiveWrapperPallas:
    """JAX/Pallas port of AutoregressiveWrapper.forward with a synthetic net."""

    def __init__(self, key, vocab=VOCAB, dim=DIM, max_seq_len=MAX_SEQ_LEN,
                 ignore_index=IGNORE_INDEX, pad_value=PAD_VALUE):
        self.ignore_index = ignore_index   # kernel assumes the default (0)
        self.pad_value = pad_value
        self.max_seq_len = max_seq_len
        k0, k1, k2 = jax.random.split(key, 3)
        emb = (jax.random.normal(k0, (vocab, dim), jnp.float32)
               * 0.02).astype(jnp.bfloat16)
        w1 = (jax.random.normal(k1, (dim, dim), jnp.float32)
              * (1.0 / dim ** 0.5)).astype(jnp.bfloat16)
        # Fold the embedding table into the first linear layer once, host-side:
        # one_hot(x) @ E @ W1 == one_hot(x) @ (E @ W1)  ->  one fewer matmul/tile.
        self.emb_w1 = jnp.dot(emb.astype(jnp.float32), w1.astype(jnp.float32),
                              preferred_element_type=jnp.float32
                              ).astype(jnp.bfloat16)
        self.b1 = jnp.zeros((1, dim), jnp.float32)
        self.w2 = (jax.random.normal(k2, (dim, vocab), jnp.float32)
                   * (1.0 / dim ** 0.5)).astype(jnp.bfloat16)
        self.b2 = jnp.zeros((1, vocab), jnp.float32)

    @functools.partial(jax.jit, static_argnums=0)
    def forward(self, x):
        # x: (b, t) int32 token ids
        xi = x[:, :-1]                       # (b, n) inputs
        xo = x[:, 1:]                        # (b, n) targets
        # TODO(synk): optional mask kwarg path (mask[:, :-1]) omitted; forward is called without a mask here.
        loss_sum, count = _fused_net_ce(xi.reshape(-1), xo.reshape(-1),
                                        self.emb_w1, self.b1, self.w2, self.b2)
        # mean over non-ignored targets (F.cross_entropy 'mean' with ignore_index).
        # Divergence: PyTorch returns NaN when ALL targets are ignored; this returns 0.
        return loss_sum / jnp.maximum(count, 1.0)

    __call__ = forward


def _reference_loss(wrapper, x):
    """Pure-JAX reference mirroring the kernel's dtype/rounding behaviour."""
    xi = x[:, :-1].reshape(-1)
    xo = x[:, 1:].reshape(-1)
    h = jnp.take(wrapper.emb_w1, xi, axis=0).astype(jnp.float32) + wrapper.b1
    h = jnp.maximum(h, 0.0).astype(jnp.bfloat16)
    logits = jnp.dot(h, wrapper.w2,
                     preferred_element_type=jnp.float32) + wrapper.b2
    row_max = jnp.max(logits, axis=-1, keepdims=True)
    p = jnp.exp(logits - row_max).astype(jnp.bfloat16).astype(jnp.float32)
    lse = row_max + jnp.log(jnp.sum(p, axis=-1, keepdims=True))
    tgt_logit = jnp.take_along_axis(logits, xo[:, None], axis=-1)
    tgt_logit = tgt_logit.astype(jnp.bfloat16).astype(jnp.float32)
    per_tok = (lse - tgt_logit)[:, 0]
    valid = (xo != IGNORE_INDEX).astype(jnp.float32)
    return jnp.sum(per_tok * valid) / jnp.maximum(jnp.sum(valid), 1.0)


if __name__ == "__main__":
    key = jax.random.PRNGKey(0)
    kp, kx = jax.random.split(key)

    wrapper = AutoregressiveWrapperPallas(kp)

    # small input: batch=2, seq=9 token ids in [0, VOCAB) (some hit ignore_index=0)
    x = jax.random.randint(kx, (2, 9), 0, VOCAB, dtype=jnp.int32)

    loss = wrapper(x)
    loss = jax.block_until_ready(loss)

    ref = _reference_loss(wrapper, x)
    assert jnp.allclose(loss, ref, atol=1e-3, rtol=1e-3), (loss, ref)

    print("KERNEL_OK")
</pallas_src>

<mosaic_0001>
module attributes {stable_mosaic.version = 11 : i64} {
  func.func @_net_ce_kernel(%arg0: i32, %arg1: memref<16x2xi32, #tpu.memory_space<vmem>>, %arg2: memref<128x32xbf16, #tpu.memory_space<vmem>>, %arg3: memref<1x32xf32, #tpu.memory_space<vmem>>, %arg4: memref<32x128xbf16, #tpu.memory_space<vmem>>, %arg5: memref<1x128xf32, #tpu.memory_space<vmem>>, %arg6: memref<1x1x128xf32, #tpu.memory_space<vmem>>) attributes {dimension_semantics = [#tpu.dimension_semantics<parallel>], iteration_bounds = array<i64: 1>, scalar_prefetch = 0 : i64, scratch_operands = 0 : i64, tpu.core_type = #tpu.core_type<tc>, window_params = [{transform_indices = @transform_0, window_bounds = array<i64: 16, 2>}, {pipeline_mode = #tpu.pipeline_mode<synchronous>, transform_indices = @transform_1, window_bounds = array<i64: 128, 32>}, {pipeline_mode = #tpu.pipeline_mode<synchronous>, transform_indices = @transform_2, window_bounds = array<i64: 1, 32>}, {pipeline_mode = #tpu.pipeline_mode<synchronous>, transform_indices = @transform_3, window_bounds = array<i64: 32, 128>}, {pipeline_mode = #tpu.pipeline_mode<synchronous>, transform_indices = @transform_4, window_bounds = array<i64: 1, 128>}, {transform_indices = @transform_5, window_bounds = array<i64: 1, 1, 128>}]} {
    %c0 = arith.constant 0 : index
    %c0_0 = arith.constant 0 : index
    %0 = vector.load %arg1[%c0, %c0_0] : memref<16x2xi32, #tpu.memory_space<vmem>>, vector<16x2xi32>
    %1 = vector.extract_strided_slice %0 {offsets = [0, 0], sizes = [16, 1], strides = [1, 1]} : vector<16x2xi32> to vector<16x1xi32>
    %2 = vector.extract_strided_slice %0 {offsets = [0, 1], sizes = [16, 1], strides = [1, 1]} : vector<16x2xi32> to vector<16x1xi32>
    %3 = tpu.iota {dimensions = array<i32: 1>} : vector<16x128xi32>
    %4 = vector.broadcast %1 : vector<16x1xi32> to vector<16x128xi32>
    %5 = arith.cmpi eq, %3, %4 : vector<16x128xi32>
    %6 = arith.extui %5 : vector<16x128xi1> to vector<16x128xi32>
    %7 = arith.sitofp %6 : vector<16x128xi32> to vector<16x128xf32>
    %8 = arith.truncf %7 : vector<16x128xf32> to vector<16x128xbf16>
    %c0_1 = arith.constant 0 : index
    %c0_2 = arith.constant 0 : index
    %9 = vector.load %arg2[%c0_1, %c0_2] : memref<128x32xbf16, #tpu.memory_space<vmem>>, vector<128x32xbf16>
    %cst = arith.constant dense<0.000000e+00> : vector<16x32xf32>
    %10 = tpu.matmul %8, %9, %cst {dimension_numbers = #tpu.dot_dimension_numbers<[1], [0], [0], [1], [0, 0, 1, 1], [], []>} : vector<16x128xbf16>, vector<128x32xbf16>, vector<16x32xf32> -> vector<16x32xf32>
    %c0_3 = arith.constant 0 : index
    %c0_4 = arith.constant 0 : index
    %11 = vector.load %arg3[%c0_3, %c0_4] : memref<1x32xf32, #tpu.memory_space<vmem>>, vector<1x32xf32>
    %12 = vector.broadcast %11 : vector<1x32xf32> to vector<16x32xf32>
    %13 = arith.addf %10, %12 : vector<16x32xf32>
    %cst_5 = arith.constant 0.000000e+00 : f32
    %14 = vector.broadcast %cst_5 : f32 to vector<16x32xf32>
    %15 = arith.maximumf %13, %14 : vector<16x32xf32>
    %16 = arith.truncf %15 : vector<16x32xf32> to vector<16x32xbf16>
    %c0_6 = arith.constant 0 : index
    %c0_7 = arith.constant 0 : index
    %17 = vector.load %arg4[%c0_6, %c0_7] : memref<32x128xbf16, #tpu.memory_space<vmem>>, vector<32x128xbf16>
    %cst_8 = arith.constant dense<0.000000e+00> : vector<16x128xf32>
    %18 = tpu.matmul %16, %17, %cst_8 {dimension_numbers = #tpu.dot_dimension_numbers<[1], [0], [0], [1], [0, 0, 1, 1], [], []>} : vector<16x32xbf16>, vector<32x128xbf16>, vector<16x128xf32> -> vector<16x128xf32>
    %c0_9 = arith.constant 0 : index
    %c0_10 = arith.constant 0 : index
    %19 = vector.load %arg5[%c0_9, %c0_10] : memref<1x128xf32, #tpu.memory_space<vmem>>, vector<1x128xf32>
    %20 = vector.broadcast %19 : vector<1x128xf32> to vector<16x128xf32>
    %21 = arith.addf %18, %20 : vector<16x128xf32>
    %cst_11 = arith.constant dense<0xFF800000> : vector<16xf32>
    %22 = vector.multi_reduction <maximumf>, %21, %cst_11 [1] : vector<16x128xf32> to vector<16xf32>
    %23 = vector.shape_cast %22 : vector<16xf32> to vector<16x1xf32>
    %cst_12 = arith.constant 1.000000e+00 : bf16
    %24 = vector.broadcast %cst_12 : bf16 to vector<128x1xbf16>
    %25 = vector.broadcast %23 : vector<16x1xf32> to vector<16x128xf32>
    %26 = arith.subf %21, %25 : vector<16x128xf32>
    %27 = math.exp %26 : vector<16x128xf32>
    %28 = arith.truncf %27 : vector<16x128xf32> to vector<16x128xbf16>
    %cst_13 = arith.constant dense<0.000000e+00> : vector<16x1xf32>
    %29 = tpu.matmul %28, %24, %cst_13 {dimension_numbers = #tpu.dot_dimension_numbers<[1], [0], [0], [1], [0, 0, 1, 1], [], []>} : vector<16x128xbf16>, vector<128x1xbf16>, vector<16x1xf32> -> vector<16x1xf32>
    %30 = vector.broadcast %2 : vector<16x1xi32> to vector<16x128xi32>
    %31 = arith.cmpi eq, %3, %30 : vector<16x128xi32>
    %cst_14 = arith.constant 0.000000e+00 : f32
    %32 = vector.broadcast %cst_14 : f32 to vector<16x128xf32>
    %33 = arith.select %31, %21, %32 : vector<16x128xi1>, vector<16x128xf32>
    %34 = arith.truncf %33 : vector<16x128xf32> to vector<16x128xbf16>
    %cst_15 = arith.constant dense<0.000000e+00> : vector<16x1xf32>
    %35 = tpu.matmul %34, %24, %cst_15 {dimension_numbers = #tpu.dot_dimension_numbers<[1], [0], [0], [1], [0, 0, 1, 1], [], []>} : vector<16x128xbf16>, vector<128x1xbf16>, vector<16x1xf32> -> vector<16x1xf32>
    %36 = math.log %29 : vector<16x1xf32>
    %37 = arith.addf %23, %36 : vector<16x1xf32>
    %c0_i32 = arith.constant 0 : i32
    %38 = vector.broadcast %c0_i32 : i32 to vector<16x1xi32>
    %39 = arith.cmpi ne, %2, %38 : vector<16x1xi32>
    %40 = arith.extui %39 : vector<16x1xi1> to vector<16x1xi32>
    %41 = arith.sitofp %40 : vector<16x1xi32> to vector<16x1xf32>
    %42 = arith.subf %37, %35 : vector<16x1xf32>
    %43 = arith.mulf %42, %41 : vector<16x1xf32>
    %44 = vector.shape_cast %43 : vector<16x1xf32> to vector<1x16x1xf32>
    %cst_16 = arith.constant dense<0.000000e+00> : vector<1xf32>
    %45 = vector.multi_reduction <add>, %44, %cst_16 [1, 2] : vector<1x16x1xf32> to vector<1xf32>
    %46 = vector.shape_cast %45 : vector<1xf32> to vector<1x1x1xf32>
    %47 = vector.extract %46[0, 0, 0] : f32 from vector<1x1x1xf32>
    %48 = vector.shape_cast %41 : vector<16x1xf32> to vector<1x16x1xf32>
    %cst_17 = arith.constant dense<0.000000e+00> : vector<1xf32>
    %49 = vector.multi_reduction <add>, %48, %cst_17 [1, 2] : vector<1x16x1xf32> to vector<1xf32>
    %50 = vector.shape_cast %49 : vector<1xf32> to vector<1x1x1xf32>
    %51 = vector.extract %50[0, 0, 0] : f32 from vector<1x1x1xf32>
    %52 = tpu.iota {dimensions = array<i32: 2>} : vector<1x1x128xi32>
    %c0_i32_18 = arith.constant 0 : i32
    %53 = vector.broadcast %c0_i32_18 : i32 to vector<1x1x128xi32>
    %54 = arith.cmpi eq, %52, %53 : vector<1x1x128xi32>
    %c1_i32 = arith.constant 1 : i32
    %55 = vector.broadcast %c1_i32 : i32 to vector<1x1x128xi32>
    %56 = arith.cmpi eq, %52, %55 : vector<1x1x128xi32>
    %cst_19 = arith.constant 0.000000e+00 : f32
    %57 = vector.broadcast %51 : f32 to vector<1x1x128xf32>
    %58 = vector.broadcast %cst_19 : f32 to vector<1x1x128xf32>
    %59 = arith.select %56, %57, %58 : vector<1x1x128xi1>, vector<1x1x128xf32>
    %60 = vector.broadcast %47 : f32 to vector<1x1x128xf32>
    %61 = arith.select %54, %60, %59 : vector<1x1x128xi1>, vector<1x1x128xf32>
    %c0_20 = arith.constant 0 : index
    %c0_21 = arith.constant 0 : index
    %c0_22 = arith.constant 0 : index
    %62 = vector.load %arg6[%c0_20, %c0_21, %c0_22] : memref<1x1x128xf32, #tpu.memory_space<vmem>>, vector<1x1x128xf32>
    tpu.vector_store %arg6[%c0_20, %c0_21, %c0_22], %61 {strides = array<i32>} : memref<1x1x128xf32, #tpu.memory_space<vmem>>, vector<1x1x128xf32>,
    return
  }
  func.func @transform_0(%arg0: i32) -> (i32, i32) {
    %c0_i32 = arith.constant 0 : i32
    %c0_i32_0 = arith.constant 0 : i32
    return %arg0, %c0_i32 : i32, i32
  }
  func.func @transform_1(%arg0: i32) -> (i32, i32) {
    %c0_i32 = arith.constant 0 : i32
    %c0_i32_0 = arith.constant 0 : i32
    %c0_i32_1 = arith.constant 0 : i32
    return %c0_i32, %c0_i32_0 : i32, i32
  }
  func.func @transform_2(%arg0: i32) -> (i32, i32) {
    %c0_i32 = arith.constant 0 : i32
    %c0_i32_0 = arith.constant 0 : i32
    %c0_i32_1 = arith.constant 0 : i32
    return %c0_i32, %c0_i32_0 : i32, i32
  }
  func.func @transform_3(%arg0: i32) -> (i32, i32) {
    %c0_i32 = arith.constant 0 : i32
    %c0_i32_0 = arith.constant 0 : i32
    %c0_i32_1 = arith.constant 0 : i32
    return %c0_i32, %c0_i32_0 : i32, i32
  }
  func.func @transform_4(%arg0: i32) -> (i32, i32) {
    %c0_i32 = arith.constant 0 : i32
    %c0_i32_0 = arith.constant 0 : i32
    %c0_i32_1 = arith.constant 0 : i32
    return %c0_i32, %c0_i32_0 : i32, i32
  }
  func.func @transform_5(%arg0: i32) -> (i32, i32, i32) {
    %c0_i32 = arith.constant 0 : i32
    %c0_i32_0 = arith.constant 0 : i32
    %c0_i32_1 = arith.constant 0 : i32
    return %arg0, %c0_i32, %c0_i32_0 : i32, i32, i32
  }
}

</mosaic_0001>

<bundles_post_ra>
// kernel: forward.1
= control target key start
LH: loop header
LB: loop body
LE: loop exit
PB: predicated region body
PF: predicated region fallthrough
CT: control target
= control target key end

     0   :  { %10 = vsyncpa [#allocation3], 0  ;;  %s585_s18 = smov [#allocation2]   ;;  %s734_s0 = inlined_call_operand.vmem [shape: s32[16,2], index: 0, kind: input, shape index: {}]   ;;  %s735_s1 = inlined_call_operand.vmem [shape: bf16[128,32], index: 1, kind: input, shape index: {}]   ;;  %s736_s2 = inlined_call_operand.vmem [shape: f32[1,32], index: 2, kind: input, shape index: {}]   ;;  %s737_s3 = inlined_call_operand.hbm [shape: bf16[32,128], index: 3, kind: input, shape index: {}]   ;;  %s738_s4 = inlined_call_operand.vmem [shape: f32[1,128], index: 4, kind: input, shape index: {}]   ;;  %s739_s5 = inlined_call_operand.vmem [shape: f32[1,1,128], index: 5, kind: output, shape index: {}]  }
   0x1   :  { %s22_s19 = sshll.u32 %s585_s18, 4  ;;  %s561_s22 = scalar_lea.hbm %s737_s3, 256  ;;  %s23_s19 = int_to_ptr.vmem [resolvable:$true] %s22_s19 }
   0x2   :  { %p562_p0 = scmp.ne.s32.totalorder %s737_s3, %s561_s22  ;;  %p565_p1 = scmp.lt.u32.totalorder %s561_s22, %s737_s3 }
   0x4   :  { %p567_p2 = pnand %p565_p1, %p562_p0 }
   0x6   :  { %570 = shalt.err (!%p567_p2)
}
   0x7   :  { %s571_s27 = scalar_lea.vmem %s23_s19, 256  ;;  %p576_p4 = scmp.lt.s32.totalorder %s23_s19, %s23_s19 }
   0x8   :  { %p572_p3 = scmp.ne.s32.totalorder %s23_s19, %s571_s27  ;;  %p577_p5 = scmp.lt.s32.totalorder %s571_s27, %s571_s27 }
   0xa   :  { %p578_p6 = por %p577_p5, %p576_p4 }
   0xc   :  { %p579_p7 = pnand %p578_p6, %p572_p3 }
   0xe   :  { %582 = shalt.err (!%p579_p7)
}
   0xf   :  { %s586_s28 = smov 64   ;;  %s587_s29 = smov 4  }
  0x10   :  { %28 = dma.hbm_to_vmem [thread:$0]  %s737_s3, 256, %s23_s19, [#allocation3], %s586_s28, %s586_s28, %s587_s29  }
  0x11   :  { %583 = dma.done.wait [#allocation3], 256  }
  0x12   :  { %584 = vsyncadd [#allocation3], 4294967040  ;;  %v588_v0 = vmov 0   ;;  %v589_v1 = vmov 0.0   ;;  %v642_v2 = vld [vmem:[%s734_s0] sm:$0xff]  ;;  %v648_v3 = vld [vmem:[%s734_s0 + $0x8] sm:$0xff]  ;;  %v38_v12 = vlaneseq }
  0x13   :  { %535 = vset.pattern.permute.xlu0 %v588_v0  ;;  %453 = vmatprep.subr.bf16.mxu0 %v589_v1  ;;  %v543_v4 = vld [vmem:[%s735_s1] sm:$0xff]   ;;  %v544_v5 = vld [vmem:[%s735_s1 + $0x8] sm:$0xff]   ;;  %vm590_vm0 = vmmov 0   ;;  %v545_v6 = vld [vmem:[%s735_s1 + $0x10] sm:$0xff]   ;;  %v591_v16 = vmov 1.0|1.0  }
  0x14   :  { %473 = vmatprep.subr.bf16.mxu1 %v589_v1  ;;  %41 = vperm.xlu0 %535, %v642_v2   ;;  %v546_v7 = vld [vmem:[%s735_s1 + $0x18] sm:$0xff]   ;;  %v547_v8 = vld [vmem:[%s735_s1 + $0x20] sm:$0xff]   ;;  %v548_v9 = vld [vmem:[%s735_s1 + $0x28] sm:$0xff]   ;;  %v687_v14 = vand.u32 127, %v38_v12  ;;  %vm191_vm4 = vcmask 261120   ;;  %v592_v29 = vmov 1  }
  0x15   :  { %454 = vmatpush3.bf16.msra.mxu0 %v543_v4  ;;  %469 = vmatprep.mubr.msk.bf16.mxu0 %vm590_vm0, %v589_v1  ;;  %v549_v10 = vld [vmem:[%s735_s1 + $0x30] sm:$0xff]   ;;  %v550_v11 = vld [vmem:[%s735_s1 + $0x38] sm:$0xff]   ;;  %v551_v17 = vld [vmem:[#allocation2] sm:$0xff]   ;;  %v593_v30 = vmov 1065369472   ;;  %vm346_vm5 = vcmp.ne.s32.totalorder %v642_v2, 0 }
  0x16   :  { %455 = vmatprep.subr.bf16.mxu0 %v589_v1  ;;  %477 = vmatprep.mubr.msk.bf16.mxu1 %vm590_vm0, %v589_v1  ;;  %v552_v18 = vld [vmem:[#allocation2 + $0x8] sm:$0xff]   ;;  %v403_v19 = vld [vmem:[%s736_s2] ss:$0 sm:$0xff]  ;;  %vm347_vm6 = vcmp.ne.s32.totalorder %v648_v3, 0  ;;  %v421_v38 = vsel %vm346_vm5, 1.0, %v589_v1  ;;  %vm364_vm10 = vcmask 7168  }
  0x17   :  { %474 = vmatpush3.bf16.msra.mxu1 %v551_v17  ;;  %537 = vset.pattern.permute.xlu1 %v592_v29  ;;  %v414_v31 = vld [vmem:[%s738_s4] ss:$0 sm:$0xff]  ;;  %v422_v39 = vsel %vm347_vm6, 1.0, %v589_v1  ;;  %s594_s4 = smov 127   ;;  %vm390_vm11 = vcmp.eq.s32.totalorder %v687_v14, 1  ;;  %vm389_vm12 = vcmp.eq.s32.totalorder %v687_v14, 0 }
  0x18   :  { %44 = vperm.xlu0 %535, %v648_v3   ;;  %475 = vmatprep.subr.bf16.mxu1 %v589_v1  ;;  %v538_v40 = vpack.i.bf16 %v422_v39, %v421_v38 }
  0x19   :  { %456 = vmatpush3.bf16.msra.mxu0 %v544_v5 }
  0x1a   :  { %457 = vmatprep.subr.bf16.mxu0 %v589_v1 }
  0x1b   :  { %476 = vmatpush3.bf16.msra.mxu1 %v552_v18 }
  0x1c   :  { %481 = vmatprep.subr.bf16.mxu1 %v589_v1  ;;  %536 = vset.pattern.permute.xlu0 %v592_v29 }
  0x1d   :  { %458 = vmatpush3.bf16.msra.mxu0 %v545_v6  ;;  %289 = vperm.xlu0 %536, %v642_v2  }
  0x1e   :  { %459 = vmatprep.subr.bf16.mxu0 %v589_v1 }
  0x21   :  { %460 = vmatpush3.bf16.msra.mxu0 %v546_v7  ;;  %539 = vrot.lane.b32.xlu0 %v538_v40, %s594_s4 }
  0x22   :  { %461 = vmatprep.subr.bf16.mxu0 %v589_v1 }
  0x25   :  { %462 = vmatpush3.bf16.msra.mxu0 %v547_v8 }
  0x26   :  { %463 = vmatprep.subr.bf16.mxu0 %v589_v1 }
  0x29   :  { %464 = vmatpush3.bf16.msra.mxu0 %v548_v9 }
  0x2a   :  { %465 = vmatprep.subr.bf16.mxu0 %v589_v1 }
  0x2d   :  { %466 = vmatpush3.bf16.msra.mxu0 %v549_v10 }
  0x2e   :  { %467 = vmatprep.subr.bf16.mxu0 %v589_v1 }
  0x31   :  { %468 = vmatpush3.bf16.msra.mxu0 %v550_v11 }
  0x32   :  { %501 = vmatprep.subr.bf16.mxu0 %v589_v1 }
  0x93   :  { %v42_v13 = vpop.permute.xlu0 %41 }
  0x94   :  { %vm46_vm1 = vcmp.eq.s32.totalorder %v687_v14, %v42_v13 }
  0x97   :  { %v45_v15 = vpop.permute.xlu0 %44 }
  0x98   :  { %vm47_vm2 = vcmp.eq.s32.totalorder %v687_v14, %v45_v15 }
  0x99   :  { %vm412_vm3 = vmpackc.low %vm47_vm2, %vm46_vm1 }
  0x9a   :  { %470 = vmatmul.mubr.msk.bf16.vlgmr.msra.gmra.mrb[0].mxu0 %vm412_vm3, %v591_v16 }
  0x9b   :  { %517 = vmatprep.mubr.msk.bf16.mxu0 %vm590_vm0, %v589_v1  ;;  %502 = vmatpush3.bf16.msra.mxu0 %v593_v30 }
  0x9c   :  { %503 = vmatprep.subr.bf16.mxu0 %v589_v1  ;;  %v290_v45 = vpop.permute.xlu0 %289 }
  0x9d   :  { %vm294_vm7 = vcmp.eq.s32.totalorder %v687_v14, %v290_v45 }
  0x9f   :  { %504 = vmatpush3.bf16.msra.mxu0 %v593_v30 }
  0xa0   :  { %505 = vmatprep.subr.bf16.mxu0 %v589_v1  ;;  %v540_v53 = vpop.permute.xlu0 %539 }
  0xa1   :  { %v542_v54 = vunpack.i.h.bf16 %v540_v53  ;;  %v541_v55 = vunpack.i.l.bf16 %v540_v53 }
  0xa3   :  { %506 = vmatpush3.bf16.msra.mxu0 %v593_v30  ;;  %v377_v56 = vsel %vm364_vm10, %v541_v55, 0.0  ;;  %v378_v57 = vsel %vm364_vm10, %v542_v54, 0.0 }
  0xa4   :  { %507 = vmatprep.subr.bf16.mxu0 %v589_v1  ;;  %v379_v58 = vadd.f32 %v378_v57, %v377_v56 }
  0xa7   :  { %508 = vmatpush3.bf16.msra.mxu0 %v593_v30 }
  0xa8   :  { %509 = vmatprep.subr.bf16.mxu0 %v589_v1 }
  0xab   :  { %510 = vmatpush3.bf16.msra.mxu0 %v593_v30 }
  0xac   :  { %511 = vmatprep.subr.bf16.mxu0 %v589_v1 }
  0xaf   :  { %512 = vmatpush3.bf16.msra.mxu0 %v593_v30 }
  0xb0   :  { %513 = vmatprep.subr.bf16.mxu0 %v589_v1 }
  0xb3   :  { %514 = vmatpush3.bf16.msra.mxu0 %v593_v30 }
  0xb4   :  { %515 = vmatprep.subr.bf16.mxu0 %v589_v1 }
  0xb7   :  { %516 = vmatpush3.bf16.msra.mxu0 %v593_v30 }
 0x16d   :  { %v158_v20 = vpop.f32.mrb[0].mxu0 }
 0x16e   :  { %v159_v21 = vadd.f32 %v403_v19, %v158_v20  ;;  %v471_v22 = vpop.f32.mrb[1].mxu0 }
 0x16f   :  { %v161_v23 = vpop.f32.mrb[2].mxu0 }
 0x170   :  { %v162_v24 = vadd.f32 %v403_v19, %v161_v23  ;;  %v472_v25 = vpop.f32.mrb[3].mxu0  ;;  %v165_v26 = vmax.f32 %v159_v21, 0.0 }
 0x172   :  { %v166_v27 = vmax.f32 %v162_v24, 0.0 }
 0x174   :  { %v167_v28 = vpack.c.bf16 %v166_v27, %v165_v26 }
 0x176   :  { %478 = vmatmul.mubr.msk.bf16.vlgmr.msra.gmra.mrb[0].mxu1 %vm191_vm4, %v167_v28 }
 0x177   :  { %497 = vmatprep.mubr.msk.bf16.mxu1 %vm590_vm0, %v589_v1  ;;  %482 = vmatpush3.bf16.msra.mxu1 %v593_v30 }
 0x178   :  { %483 = vmatprep.subr.bf16.mxu1 %v589_v1 }
 0x17b   :  { %484 = vmatpush3.bf16.msra.mxu1 %v593_v30 }
 0x17c   :  { %485 = vmatprep.subr.bf16.mxu1 %v589_v1 }
 0x17f   :  { %486 = vmatpush3.bf16.msra.mxu1 %v593_v30 }
 0x180   :  { %487 = vmatprep.subr.bf16.mxu1 %v589_v1 }
 0x183   :  { %488 = vmatpush3.bf16.msra.mxu1 %v593_v30 }
 0x184   :  { %489 = vmatprep.subr.bf16.mxu1 %v589_v1 }
 0x187   :  { %490 = vmatpush3.bf16.msra.mxu1 %v593_v30 }
 0x188   :  { %491 = vmatprep.subr.bf16.mxu1 %v589_v1 }
 0x18b   :  { %492 = vmatpush3.bf16.msra.mxu1 %v593_v30 }
 0x18c   :  { %493 = vmatprep.subr.bf16.mxu1 %v589_v1 }
 0x18f   :  { %494 = vmatpush3.bf16.msra.mxu1 %v593_v30 }
 0x190   :  { %495 = vmatprep.subr.bf16.mxu1 %v589_v1 }
 0x193   :  { %496 = vmatpush3.bf16.msra.mxu1 %v593_v30 }
 0x249   :  { %v229_v32 = vpop.f32.mrb[0].mxu1 }
 0x24a   :  { %v230_v33 = vadd.f32 %v414_v31, %v229_v32  ;;  %v479_v34 = vpop.f32.mrb[1].mxu1 }
 0x24b   :  { %v232_v35 = vpop.f32.mrb[2].mxu1 }
 0x24c   :  { %236 = vmax.xlane.f32.xlu1 %v230_v33  ;;  %v480_v36 = vpop.f32.mrb[3].mxu1  ;;  %v233_v37 = vadd.f32 %v414_v31, %v232_v35 }
 0x24e   :  { %v419_v49 = vpack.c.bf16 %v233_v37, %v230_v33 }
 0x250   :  { %238 = vmax.xlane.f32.xlu1 %v233_v37 }
 0x261   :  { %292 = vperm.xlu1 %537, %v648_v3  }
 0x285   :  { %380 = vadd.xlane.f32.xlu1 %v379_v58 }
 0x2d9   :  { %v237_v41 = vpop.xlane.xlu1 %236 }
 0x2da   :  { %v240_v42 = vsub.f32 %v230_v33, %v237_v41 }
 0x2dc   :  { %v242_v43 = vmul.f32 1.442695, %v240_v42 }
 0x2dd   :  { %v239_v44 = vpop.xlane.xlu1 %238 }
 0x2de   :  { %v241_v46 = vsub.f32 %v233_v37, %v239_v44  ;;  %553 = vpow2.f32 %v242_v43 }
 0x2e0   :  { %v244_v47 = vmul.f32 1.442695, %v241_v46 }
 0x2e1   :  { %v293_v48 = vpop.permute.xlu1 %292 }
 0x2e2   :  { %555 = vpow2.f32 %v244_v47  ;;  %vm295_vm8 = vcmp.eq.s32.totalorder %v687_v14, %v293_v48 }
 0x2e3   :  { %vm418_vm9 = vmpackc.low %vm295_vm8, %vm294_vm7 }
 0x2e4   :  { %518 = vmatmul.mubr.msk.bf16.vlgmr.msra.gmra.mrb[4].mxu0 %vm418_vm9, %v419_v49 }
 0x2e8   :  { %v554_v50 = vpop.eup %553 }
 0x2ec   :  { %v556_v51 = vpop.eup %555 }
 0x2ed   :  { %v246_v52 = vpack.c.bf16 %v556_v51, %v554_v50 }
 0x2ef   :  { %498 = vmatmul.mubr.bf16.vlgmr.msra.gmra.mrb[4].mxu1 %v246_v52 }
 0x312   :  { %v381_v17 = vpop.xlane.xlu1 %380 }
 0x313   :  { %v382_v18 = vrot.slane %v381_v17, 4 }
 0x315   :  { %v383_v19 = vadd.f32 %v382_v18, %v381_v17 }
 0x317   :  { %v384_v20 = vrot.slane %v383_v19, 2 }
 0x319   :  { %v385_v24 = vadd.f32 %v384_v20, %v383_v19 }
 0x31b   :  { %v386_v27 = vrot.slane %v385_v24, 1 }
 0x31d   :  { %v387_v30 = vadd.f32 %v386_v27, %v385_v24 }
 0x3b7   :  { %v333_v59 = vpop.f32.mrb[4].mxu0 }
 0x3b8   :  { %v519_v60 = vpop.f32.mrb[5].mxu0 }
 0x3b9   :  { %v336_v61 = vpop.f32.mrb[6].mxu0 }
 0x3ba   :  { %v520_v62 = vpop.f32.mrb[7].mxu0 }
 0x3c2   :  { %v281_v63 = vpop.f32.mrb[4].mxu1 }
 0x3c3   :  { %557 = vlog2.f32 %v281_v63  ;;  %v499_v0 = vpop.f32.mrb[5].mxu1 }
 0x3c4   :  { %v284_v1 = vpop.f32.mrb[6].mxu1 }
 0x3c5   :  { %559 = vlog2.f32 %v284_v1  ;;  %v500_v2 = vpop.f32.mrb[7].mxu1 }
 0x3cd   :  { %v558_v3 = vpop.eup %557 }
 0x3ce   :  { %v341_v4 = vmul.f32 0.6931472, %v558_v3 }
 0x3cf   :  { %v560_v5 = vpop.eup %559 }
 0x3d0   :  { %v344_v6 = vadd.f32 %v341_v4, %v237_v41  ;;  %v343_v7 = vmul.f32 0.6931472, %v560_v5 }
 0x3d2   :  { %v345_v8 = vadd.f32 %v343_v7, %v239_v44  ;;  %v352_v9 = vsub.f32 %v344_v6, %v333_v59 }
 0x3d4   :  { %v353_v10 = vsub.f32 %v345_v8, %v336_v61  ;;  %v362_v11 = vmul.f32 %v541_v55, %v352_v9 }
 0x3d6   :  { %v363_v12 = vmul.f32 %v542_v54, %v353_v10  ;;  %v365_v13 = vsel %vm364_vm10, %v362_v11, 0.0 }
 0x3d8   :  { %v366_v15 = vsel %vm364_vm10, %v363_v12, 0.0 }
 0x3d9   :  { %v367_v16 = vadd.f32 %v366_v15, %v365_v13 }
 0x3db   :  { %368 = vadd.xlane.f32.xlu0 %v367_v16 }
 0x468   :  { %v369_v21 = vpop.xlane.xlu0 %368 }
 0x469   :  { %v370_v22 = vrot.slane %v369_v21, 4 }
 0x46b   :  { %v371_v23 = vadd.f32 %v370_v22, %v369_v21 }
 0x46d   :  { %v372_v25 = vrot.slane %v371_v23, 2 }
 0x46f   :  { %v373_v26 = vadd.f32 %v372_v25, %v371_v23 }
 0x471   :  { %v374_v28 = vrot.slane %v373_v26, 1 }
 0x473   :  { %v375_v29 = vadd.f32 %v374_v28, %v373_v26 }
 0x475   :  { %521 = vpush %v375_v29 }
 0x476   :  { %523 = vpush %v387_v30 }
 0x4a6   :  { %s522_s27 = spop %521 }
 0x4a7   :  { %v393_v31 = vstv %s522_s27  ;;  %s524_s28 = spop %523 }
 0x4a8   :  { %v391_v32 = vstv %s524_s28 }
 0x4a9   :  { %v392_v33 = vsel %vm390_vm11, %v391_v32, 0.0 }
 0x4aa   :  { %v394_v34 = vsel %vm389_vm12, %v393_v31, %v392_v33 }
 0x4ab   :  { %395 = vst [vmem:[%s739_s5] sm:$0x1] %v394_v34 }
 0x4ac   :  { %400 = vsyncpa [#allocation3], 1 }

</bundles_post_ra>
